<compile_context>
chip_gen: v6e
topology: v6e:2x2x1
jax: 0.10.0
libtpu: 0.0.40
codegen_flags: <defaults>
</compile_context>

<pallas_src>
import functools

import jax
import jax.numpy as jnp
from jax import lax
from jax.experimental import pallas as pl
from jax.experimental.pallas import tpu as pltpu

_NEG = -1e30   # Python float: large finite negative so the masked softmax never yields NaN


def glad_score_kernel(n_vals,                         # static Python int: real ontology values
                      params_ref,                     # SMEM (2,) f32: [bias, score_weight]
                      utt_len_ref, act_len_ref,       # VMEM (B, 1) int32
                      h_ref, cu_ref, a_ref, cve_ref,  # VMEM bf16 tiles
                      out_ref):                       # VMEM (B, Vp) f32
    b, t, d = h_ref.shape
    amax = a_ref.shape[1]
    vp = cve_ref.shape[0]

    bias = params_ref[0]
    score_w = params_ref[1]

    # ---- system-act attention (tiny: VPU multiply + XLU reduce, kept in f32) ----
    A = a_ref[...].astype(jnp.float32)                          # (B, Amax, D)
    CU = cu_ref[...].astype(jnp.float32)                        # (B, 1, D)
    s_act = jnp.sum(A * CU, axis=-1)                            # (B, Amax)
    a_idx = lax.broadcasted_iota(jnp.int32, (b, amax), 1)
    s_act = jnp.where(a_idx < act_len_ref[...], s_act, _NEG)    # mask padded acts
    s_act = s_act - jnp.max(s_act, axis=1, keepdims=True)
    e_act = jnp.exp(s_act)
    p_act = e_act * pl.reciprocal(jnp.sum(e_act, axis=1, keepdims=True), approx=True)
    q_act = jnp.sum(p_act[:, :, None] * A, axis=1)              # (B, D) f32

    # ---- single fused MXU matmul over D ----
    # LHS rows 0 .. B*T-1 : H flattened  -> scores vs every value + the H@w column
    # LHS rows B*T ..     : q_act        -> y_acts (plus a throwaway q_act@w column)
    # RHS rows 0 .. V-1   : C_vals ; row V : utt_scorer weight ; rows > V : zero padding
    lhs = jnp.concatenate(
        [h_ref[...].reshape(b * t, d), q_act.astype(h_ref.dtype)], axis=0)    # (B*T+B, D) bf16
    big = lax.dot_general(lhs, cve_ref[...], (((1,), (1,)), ((), ())),
                          preferred_element_type=jnp.float32)                 # (B*T+B, Vp) f32

    R = big[:b * t, :].reshape(b, t, vp)                        # (B, T, Vp) raw scores
    hw = R[:, :, n_vals:n_vals + 1]                             # (B, T, 1) == H @ w_scorer
    y_acts = big[b * t:, :]                                     # (B, Vp)

    # ---- utterance attention: softmax over T per value column, utt_scorer folded in ----
    t_idx = lax.broadcasted_iota(jnp.int32, (b, t, 1), 1)
    S = jnp.where(t_idx < utt_len_ref[...][:, :, None], R, _NEG)
    S = S - jnp.max(S, axis=1, keepdims=True)
    E = jnp.exp(S)
    P = E * pl.reciprocal(jnp.sum(E, axis=1, keepdims=True), approx=True)
    y_utts = jnp.sum(P * hw, axis=1) + bias                     # (B, Vp)

    # ---- combine: sigmoid(y_utts + score_weight * y_acts), lane-dense store ----
    out_ref[...] = jax.nn.sigmoid(y_utts + score_w * y_acts)


def _round_up(x, m):
    return ((x + m - 1) // m) * m


def glad_scores(H_utt, c_utt, C_acts, C_vals, w_scorer, b_scorer, score_weight,
                utt_len, act_len):
    """Scores every ontology value in C_vals for every example (sigmoid probabilities).

    C_vals may be the concatenation of all slots' value encodings; the caller slices
    the returned (B, V) matrix per slot.
    """
    B, T, D = H_utt.shape
    V = C_vals.shape[0]
    Vp = _round_up(V + 1, 128)     # +1: utt_scorer weight rides along as RHS row V

    bf16 = jnp.bfloat16
    H = H_utt.astype(bf16)                                       # (B, T, D)
    CU = c_utt.reshape(B, 1, D).astype(bf16)                     # (B, 1, D)
    A = C_acts.astype(bf16)                                      # (B, Amax, D)
    # Extended RHS: ontology values, then the scorer weight, then zero padding to 128 lanes.
    CVe = (jnp.zeros((Vp, D), bf16)
           .at[:V].set(C_vals.astype(bf16))
           .at[V].set(w_scorer.astype(bf16)))                    # (Vp, D)

    params = jnp.stack([jnp.asarray(b_scorer, jnp.float32),
                        jnp.asarray(score_weight, jnp.float32)])
    ul = jnp.maximum(utt_len.astype(jnp.int32), 1).reshape(B, 1)
    al = jnp.maximum(act_len.astype(jnp.int32), 1).reshape(B, 1)

    out = pl.pallas_call(
        functools.partial(glad_score_kernel, V),
        out_shape=jax.ShapeDtypeStruct((B, Vp), jnp.float32),
        in_specs=[
            pl.BlockSpec(memory_space=pltpu.MemorySpace.SMEM),   # [bias, score_weight]
            pl.BlockSpec(memory_space=pltpu.MemorySpace.VMEM),   # utt_len (B, 1)
            pl.BlockSpec(memory_space=pltpu.MemorySpace.VMEM),   # act_len (B, 1)
            pl.BlockSpec(memory_space=pltpu.MemorySpace.VMEM),   # H_utt
            pl.BlockSpec(memory_space=pltpu.MemorySpace.VMEM),   # c_utt
            pl.BlockSpec(memory_space=pltpu.MemorySpace.VMEM),   # C_acts
            pl.BlockSpec(memory_space=pltpu.MemorySpace.VMEM),   # C_vals + w_scorer (shared RHS)
        ],
        out_specs=pl.BlockSpec(memory_space=pltpu.MemorySpace.VMEM),
    )(params, ul, al, H, CU, A, CVe)
    return out[:, :V]


if __name__ == "__main__":
    key = jax.random.PRNGKey(0)
    B, T, Amax = 2, 8, 8
    demb, dhid = 32, 32
    D = 2 * dhid
    V = 8                    # number of ontology values for this slot
    vocab_size = 50

    ks = jax.random.split(key, 8)

    # FixedEmbedding stand-in (eval mode: dropout is identity, result detached)
    emb = jax.random.normal(ks[0], (vocab_size, demb), jnp.float32) * 0.1
    # encoder stand-in projection (see TODO above)
    W_enc = jax.random.normal(ks[1], (demb, D), jnp.float32) * 0.2

    utt_tokens = jax.random.randint(ks[2], (B, T), 0, vocab_size)
    act_tokens = jax.random.randint(ks[3], (B, Amax), 0, vocab_size)
    val_tokens = jax.random.randint(ks[4], (V,), 0, vocab_size)

    utt_len = jnp.array([T, T - 3], dtype=jnp.int32)      # ragged utterance lengths
    act_len = jnp.array([Amax - 2, Amax], dtype=jnp.int32)

    def encode(tok):  # glue: embedding lookup + projection
        return jnp.tanh(emb[tok] @ W_enc)

    H_utt = encode(utt_tokens)                            # [B, T, D]
    t_idx = jnp.arange(T)[None, :, None]
    mask = (t_idx < utt_len[:, None, None]).astype(jnp.float32)
    c_utt = (H_utt * mask).sum(1) / utt_len[:, None].astype(jnp.float32)   # [B, D] summary
    C_acts = encode(act_tokens)                           # [B, Amax, D]
    C_vals = encode(val_tokens)                           # [V, D]

    # utt_scorer = nn.Linear(2*dhid, 1); score_weight = 0.5
    w_scorer = jax.random.normal(ks[5], (D,), jnp.float32) * 0.3
    b_scorer = jnp.float32(0.05)
    score_weight = jnp.float32(0.5)

    ys = glad_scores(H_utt, c_utt, C_acts, C_vals, w_scorer, b_scorer, score_weight,
                     utt_len, act_len)
    jax.block_until_ready(ys)

    # pure-JAX reference mirroring the PyTorch attend / utt_scorer / mm / sigmoid path
    def ref():
        out = []
        for b in range(B):
            Hb = H_utt[b]; l = int(utt_len[b])
            S = Hb @ C_vals.T                             # [T, V]
            S = S.at[l:, :].set(-jnp.inf)
            P = jax.nn.softmax(S, axis=0)
            Q = P.T @ Hb                                  # [V, D]
            y_utt = Q @ w_scorer + b_scorer               # [V]
            Ab = C_acts[b]; la = int(act_len[b])
            s = Ab @ c_utt[b]
            s = s.at[la:].set(-jnp.inf)
            p = jax.nn.softmax(s)
            q_act = p @ Ab                                # [D]
            y_act = C_vals @ q_act                        # [V]
            out.append(jax.nn.sigmoid(y_utt + score_weight * y_act))
        return jnp.stack(out)

    ref_ys = ref()
    # tolerance covers the bf16 MXU operands and the EUP approximate reciprocal in the softmaxes
    assert jnp.allclose(ys, ref_ys, atol=1e-2, rtol=1e-2), (ys, ref_ys)
    print("KERNEL_OK")
</pallas_src>

<mosaic_0001>
module attributes {stable_mosaic.version = 11 : i64} {
  func.func @glad_score_kernel(%arg0: memref<2xf32, #tpu.memory_space<smem>>, %arg1: memref<2x1xi32, #tpu.memory_space<vmem>>, %arg2: memref<2x1xi32, #tpu.memory_space<vmem>>, %arg3: memref<2x8x64xbf16, #tpu.memory_space<vmem>>, %arg4: memref<2x1x64xbf16, #tpu.memory_space<vmem>>, %arg5: memref<2x8x64xbf16, #tpu.memory_space<vmem>>, %arg6: memref<128x64xbf16, #tpu.memory_space<vmem>>, %arg7: memref<2x128xf32, #tpu.memory_space<vmem>>) attributes {dimension_semantics = [], scalar_prefetch = 0 : i64, scratch_operands = 0 : i64, tpu.core_type = #tpu.core_type<tc>} {
    %c0 = arith.constant 0 : index
    %0 = memref.load %arg0[%c0] : memref<2xf32, #tpu.memory_space<smem>>
    %c1 = arith.constant 1 : index
    %1 = memref.load %arg0[%c1] : memref<2xf32, #tpu.memory_space<smem>>
    %c0_0 = arith.constant 0 : index
    %c0_1 = arith.constant 0 : index
    %c0_2 = arith.constant 0 : index
    %2 = vector.load %arg5[%c0_0, %c0_1, %c0_2] : memref<2x8x64xbf16, #tpu.memory_space<vmem>>, vector<2x8x64xbf16>
    %3 = arith.extf %2 : vector<2x8x64xbf16> to vector<2x8x64xf32>
    %c0_3 = arith.constant 0 : index
    %c0_4 = arith.constant 0 : index
    %c0_5 = arith.constant 0 : index
    %4 = vector.load %arg4[%c0_3, %c0_4, %c0_5] : memref<2x1x64xbf16, #tpu.memory_space<vmem>>, vector<2x1x64xbf16>
    %5 = arith.extf %4 : vector<2x1x64xbf16> to vector<2x1x64xf32>
    %6 = vector.broadcast %5 : vector<2x1x64xf32> to vector<2x8x64xf32>
    %7 = arith.mulf %3, %6 : vector<2x8x64xf32>
    %cst = arith.constant dense<0.000000e+00> : vector<2x8xf32>
    %8 = vector.multi_reduction <add>, %7, %cst [2] : vector<2x8x64xf32> to vector<2x8xf32>
    %9 = tpu.iota {dimensions = array<i32: 1>} : vector<2x8xi32>
    %c0_6 = arith.constant 0 : index
    %c0_7 = arith.constant 0 : index
    %10 = vector.load %arg2[%c0_6, %c0_7] : memref<2x1xi32, #tpu.memory_space<vmem>>, vector<2x1xi32>
    %11 = vector.broadcast %10 : vector<2x1xi32> to vector<2x8xi32>
    %12 = arith.cmpi slt, %9, %11 : vector<2x8xi32>
    %cst_8 = arith.constant -1.000000e+30 : f32
    %13 = vector.broadcast %cst_8 : f32 to vector<2x8xf32>
    %14 = arith.select %12, %8, %13 : vector<2x8xi1>, vector<2x8xf32>
    %cst_9 = arith.constant dense<0xFF800000> : vector<2xf32>
    %15 = vector.multi_reduction <maximumf>, %14, %cst_9 [1] : vector<2x8xf32> to vector<2xf32>
    %16 = vector.shape_cast %15 : vector<2xf32> to vector<2x1xf32>
    %17 = vector.broadcast %16 : vector<2x1xf32> to vector<2x8xf32>
    %18 = arith.subf %14, %17 : vector<2x8xf32>
    %19 = math.exp %18 : vector<2x8xf32>
    %cst_10 = arith.constant dense<0.000000e+00> : vector<2xf32>
    %20 = vector.multi_reduction <add>, %19, %cst_10 [1] : vector<2x8xf32> to vector<2xf32>
    %21 = vector.shape_cast %20 : vector<2xf32> to vector<2x1xf32>
    %22 = tpu.reciprocal %21 {approx = true} : vector<2x1xf32> -> vector<2x1xf32>
    %23 = vector.broadcast %22 : vector<2x1xf32> to vector<2x8xf32>
    %24 = arith.mulf %19, %23 : vector<2x8xf32>
    %25 = vector.shape_cast %24 : vector<2x8xf32> to vector<2x8x1xf32>
    %26 = vector.broadcast %25 : vector<2x8x1xf32> to vector<2x8x64xf32>
    %27 = arith.mulf %26, %3 : vector<2x8x64xf32>
    %cst_11 = arith.constant dense<0.000000e+00> : vector<2x64xf32>
    %28 = vector.multi_reduction <add>, %27, %cst_11 [1] : vector<2x8x64xf32> to vector<2x64xf32>
    %c0_12 = arith.constant 0 : index
    %c0_13 = arith.constant 0 : index
    %c0_14 = arith.constant 0 : index
    %29 = vector.load %arg3[%c0_12, %c0_13, %c0_14] : memref<2x8x64xbf16, #tpu.memory_space<vmem>>, vector<2x8x64xbf16>
    %30 = vector.shape_cast %29 : vector<2x8x64xbf16> to vector<16x64xbf16>
    %31 = arith.truncf %28 : vector<2x64xf32> to vector<2x64xbf16>
    %32 = tpu.concatenate %30, %31 in 0 : vector<16x64xbf16>, vector<2x64xbf16> -> vector<18x64xbf16>
    %c0_15 = arith.constant 0 : index
    %c0_16 = arith.constant 0 : index
    %33 = vector.load %arg6[%c0_15, %c0_16] : memref<128x64xbf16, #tpu.memory_space<vmem>>, vector<128x64xbf16>
    %cst_17 = arith.constant dense<0.000000e+00> : vector<18x128xf32>
    %34 = tpu.matmul %32, %33, %cst_17 {dimension_numbers = #tpu.dot_dimension_numbers<[1], [1], [0], [0], [0, 0, 1, 0], [], []>} : vector<18x64xbf16>, vector<128x64xbf16>, vector<18x128xf32> -> vector<18x128xf32>
    %35 = vector.extract_strided_slice %34 {offsets = [0, 0], sizes = [16, 128], strides = [1, 1]} : vector<18x128xf32> to vector<16x128xf32>
    %36 = vector.shape_cast %35 : vector<16x128xf32> to vector<2x8x128xf32>
    %37 = vector.extract_strided_slice %36 {offsets = [0, 0, 8], sizes = [2, 8, 1], strides = [1, 1, 1]} : vector<2x8x128xf32> to vector<2x8x1xf32>
    %38 = vector.extract_strided_slice %34 {offsets = [16, 0], sizes = [2, 128], strides = [1, 1]} : vector<18x128xf32> to vector<2x128xf32>
    %39 = tpu.iota {dimensions = array<i32: 1>} : vector<2x8x1xi32>
    %c0_18 = arith.constant 0 : index
    %c0_19 = arith.constant 0 : index
    %40 = vector.load %arg1[%c0_18, %c0_19] : memref<2x1xi32, #tpu.memory_space<vmem>>, vector<2x1xi32>
    %41 = vector.shape_cast %40 : vector<2x1xi32> to vector<2x1x1xi32>
    %42 = vector.broadcast %41 : vector<2x1x1xi32> to vector<2x8x1xi32>
    %43 = arith.cmpi slt, %39, %42 : vector<2x8x1xi32>
    %cst_20 = arith.constant -1.000000e+30 : f32
    %44 = vector.shape_cast %43 : vector<2x8x1xi1> to vector<2x8x1xi1>
    %45 = vector.broadcast %44 : vector<2x8x1xi1> to vector<2x8x128xi1>
    %46 = vector.broadcast %cst_20 : f32 to vector<2x8x128xf32>
    %47 = arith.select %45, %36, %46 : vector<2x8x128xi1>, vector<2x8x128xf32>
    %cst_21 = arith.constant dense<0xFF800000> : vector<2x128xf32>
    %48 = vector.multi_reduction <maximumf>, %47, %cst_21 [1] : vector<2x8x128xf32> to vector<2x128xf32>
    %49 = vector.shape_cast %48 : vector<2x128xf32> to vector<2x1x128xf32>
    %50 = vector.broadcast %49 : vector<2x1x128xf32> to vector<2x8x128xf32>
    %51 = arith.subf %47, %50 : vector<2x8x128xf32>
    %52 = math.exp %51 : vector<2x8x128xf32>
    %cst_22 = arith.constant dense<0.000000e+00> : vector<2x128xf32>
    %53 = vector.multi_reduction <add>, %52, %cst_22 [1] : vector<2x8x128xf32> to vector<2x128xf32>
    %54 = vector.shape_cast %53 : vector<2x128xf32> to vector<2x1x128xf32>
    %55 = tpu.reciprocal %54 {approx = true} : vector<2x1x128xf32> -> vector<2x1x128xf32>
    %56 = vector.broadcast %55 : vector<2x1x128xf32> to vector<2x8x128xf32>
    %57 = arith.mulf %52, %56 : vector<2x8x128xf32>
    %58 = vector.broadcast %37 : vector<2x8x1xf32> to vector<2x8x128xf32>
    %59 = arith.mulf %57, %58 : vector<2x8x128xf32>
    %cst_23 = arith.constant dense<0.000000e+00> : vector<2x128xf32>
    %60 = vector.multi_reduction <add>, %59, %cst_23 [1] : vector<2x8x128xf32> to vector<2x128xf32>
    %61 = vector.broadcast %0 : f32 to vector<2x128xf32>
    %62 = arith.addf %60, %61 : vector<2x128xf32>
    %63 = vector.broadcast %1 : f32 to vector<2x128xf32>
    %64 = arith.mulf %63, %38 : vector<2x128xf32>
    %65 = arith.addf %62, %64 : vector<2x128xf32>
    %66 = arith.negf %65 : vector<2x128xf32>
    %67 = math.exp %66 : vector<2x128xf32>
    %cst_24 = arith.constant 1.000000e+00 : f32
    %68 = vector.broadcast %cst_24 : f32 to vector<2x128xf32>
    %69 = arith.addf %68, %67 : vector<2x128xf32>
    %70 = arith.divf %68, %69 : vector<2x128xf32>
    %c0_25 = arith.constant 0 : index
    %c0_26 = arith.constant 0 : index
    %71 = vector.load %arg7[%c0_25, %c0_26] : memref<2x128xf32, #tpu.memory_space<vmem>>, vector<2x128xf32>
    tpu.vector_store %arg7[%c0_25, %c0_26], %70 {strides = array<i32>} : memref<2x128xf32, #tpu.memory_space<vmem>>, vector<2x128xf32>,
    return
  }
}

</mosaic_0001>

<bundles_post_ra>
// kernel: tpu_custom_call.1
= control target key start
LH: loop header
LB: loop body
LE: loop exit
PB: predicated region body
PF: predicated region fallthrough
CT: control target
= control target key end

     0   :  { %12 = vsyncpa [#allocation4], 0  ;;  %s713_s0 = inlined_call_operand.vmem [shape: f32[2], index: 0, kind: input, shape index: {}]   ;;  %s714_s1 = inlined_call_operand.vmem [shape: s32[2,1], index: 1, kind: input, shape index: {}]   ;;  %s715_s2 = inlined_call_operand.vmem [shape: s32[2,1], index: 2, kind: input, shape index: {}]   ;;  %s716_s3 = inlined_call_operand.vmem [shape: bf16[2,8,64], index: 3, kind: input, shape index: {}]   ;;  %s717_s4 = inlined_call_operand.vmem [shape: bf16[2,1,64], index: 4, kind: input, shape index: {}]   ;;  %s718_s5 = inlined_call_operand.vmem [shape: bf16[2,8,64], index: 5, kind: input, shape index: {}]   ;;  %s719_s6 = inlined_call_operand.vmem [shape: bf16[128,64], index: 6, kind: input, shape index: {}]   ;;  %s720_s7 = inlined_call_operand.hbm [shape: f32[2,128], index: 7, kind: output, shape index: {}]  }
   0x1   :  { %13 = vsyncpa [#allocation3], 0  ;;  %s20_s26 = sshll.u32 %s713_s0, 4  ;;  %s21_s26 = int_to_ptr.vmem [resolvable:$true] %s20_s26 }
   0x2   :  { %s523_s27 = scalar_lea.vmem %s21_s26, 16  ;;  %p528_p1 = scmp.lt.s32.totalorder %s21_s26, %s21_s26 }
   0x3   :  { %p524_p0 = scmp.ne.s32.totalorder %s21_s26, %s523_s27  ;;  %p529_p2 = scmp.lt.s32.totalorder %s523_s27, %s523_s27 }
   0x5   :  { %p530_p3 = por %p529_p2, %p528_p1 }
   0x7   :  { %p531_p4 = pnand %p530_p3, %p524_p0 }
   0x9   :  { %534 = shalt.err (!%p531_p4)
}
   0xa   :  { %s559_s28 = smov [#allocation2]  }
   0xb   :  { %23 = dma.vmem_to_smem %s21_s26, 16, %s559_s28, [#allocation4]  }
   0xc   :  { %555 = dma.done.wait [#allocation4], 16  }
   0xd   :  { %556 = vsyncadd [#allocation4], 4294967280 }
   0xe   :  { %39 = sfence }
   0xf   :  { %v610_v0 = vld [vmem:[%s718_s5] sm:$0xff]   ;;  %v51_v2 = vlaneseq  ;;  %v560_v8 = vmov 0   ;;  %vm61_vm0 = vcmask 523264   ;;  %v561_v21 = vmov 1966171168   ;;  %v494_v41 = vld [vmem:[%s719_s6 + $0x38] sm:$0xff]  }
  0x10   :  { %v47_v1 = vld [vmem:[%s717_s4] sm:$0x1]  ;;  %v48_v3 = vld [vmem:[%s717_s4 + $0x1] sm:$0x1]  ;;  %491 = vset.pattern.permute.xlu1 %v560_v8  ;;  %492 = vset.pattern.permute.xlu0 %v560_v8  ;;  %v446_v9 = vunpack.c.l.bf16 %v610_v0  ;;  %v447_v11 = vunpack.c.h.bf16 %v610_v0  ;;  %v292_v22 = vunpack.c.l.s4 %v561_v21  ;;  %vm85_vm1 = vcmask 1041409   ;;  %v495_v42 = vld [vmem:[%s719_s6 + $0x30] sm:$0xff]  }
  0x11   :  { %v70_v4 = vld [vmem:[%s715_s2] sm:$0x3]  ;;  %v49_v5 = vunpack.c.l.bf16 %v47_v1  ;;  %v621_v6 = vshrl.u32 %v51_v2, 7  ;;  %v50_v7 = vunpack.c.l.bf16 %v48_v3  ;;  %v69_v18 = vand.u32 127, %v51_v2  ;;  %478 = vmatprep.subr.msk.bf16.mxu0 %vm61_vm0, %v494_v41  ;;  %v496_v45 = vld [vmem:[%s719_s6 + $0x28] sm:$0xff]   ;;  %v498_v49 = vld [vmem:[%s719_s6 + $0x18] sm:$0xff]  }
  0x12   :  { %72 = vperm.xlu1 %491, %v70_v4   ;;  %v293_v27 = vunpack.c.0.s8 %v292_v22  ;;  %vm89_vm3 = vcmask 58368   ;;  %v441_v32 = vld.sshfl [vmem:[%s714_s1] sm:$0x11 pattern:$0x75316420]  ;;  %v230_v43 = vsel %vm61_vm0, %v494_v41, 0 }
  0x13   :  { %v627_v10 = vsub.s32 0, %v621_v6  ;;  %v79_v20 = vsub.s32 %v69_v18, %v621_v6  ;;  %459 = vmatpush3.bf16.xpose.msra.mxu0 %v230_v43  ;;  %v227_v44 = vsel %vm61_vm0, %v495_v42, 0  ;;  %v224_v46 = vsel %vm61_vm0, %v496_v45, 0  ;;  %v497_v47 = vld [vmem:[%s719_s6 + $0x20] sm:$0xff]   ;;  %v499_v52 = vld [vmem:[%s719_s6 + $0x10] sm:$0xff]   ;;  %v500_v55 = vld [vmem:[%s719_s6 + $0x8] sm:$0xff]  }
  0x14   :  { %v296_v31 = vsub.s32 %v293_v27, %v621_v6  ;;  %479 = vmatprep.subr.msk.bf16.mxu0 %vm61_vm0, %v495_v42  ;;  %v221_v48 = vsel %vm61_vm0, %v497_v47, 0  ;;  %v218_v50 = vsel %vm61_vm0, %v498_v49, 0  ;;  %v215_v53 = vsel %vm61_vm0, %v499_v52, 0  ;;  %v501_v61 = vld [vmem:[%s719_s6] sm:$0xff]   ;;  %s41_s6 = sld [smem:[#allocation2]]  ;;  %s563_s29 = smov [#allocation5]  }
  0x15   :  { %v54_v12 = vrot.slane %v49_v5, %v627_v10  ;;  %v58_v13 = vrot.slane %v50_v7, %v627_v10  ;;  %v212_v57 = vsel %vm61_vm0, %v500_v55, 0  ;;  %v110_v59 = vsub.s32 1, %v621_v6  ;;  %v502_v63 = vld [vmem:[%s716_s3] sm:$0xff]   ;;  %s429_s3 = sld [smem:[#allocation2 + $0x1]]  ;;  %s420_s30 = sshll.u32 %s563_s29, 4  ;;  %s421_s30 = int_to_ptr.vmem [resolvable:$true] %s420_s30 }
  0x16   :  { %v297_v33 = vrot.slane %v441_v32, %v296_v31  ;;  %v209_v62 = vsel %vm61_vm0, %v501_v61, 0  ;;  %474 = vmatprep.mubr.msk.bf16.mxu0 %vm61_vm0, %v502_v63  ;;  %v290_v1 = vcombine.high %v441_v32, %v441_v32  ;;  %s535_s8 = scalar_lea.vmem %s421_s30, 32  ;;  %p540_p6 = scmp.lt.s32.totalorder %s421_s30, %s421_s30 }
  0x17   :  { %v59_v14 = vmul.f32 %v446_v9, %v54_v12  ;;  %v60_v15 = vmul.f32 %v447_v11, %v58_v13  ;;  %p536_p5 = scmp.ne.s32.totalorder %s421_s30, %s535_s8  ;;  %p541_p7 = scmp.lt.s32.totalorder %s535_s8, %s535_s8 }
  0x18   :  { %v308_v34 = vrot.slane %v297_v33, %v627_v10  ;;  %v304_v2 = vrot.slane %v290_v1, %v296_v31 }
  0x19   :  { %v62_v16 = vsel %vm61_vm0, %v59_v14, 0.0  ;;  %v65_v17 = vsel %vm61_vm0, %v60_v15, 0.0  ;;  %p542_p8 = por %p541_p7, %p540_p6 }
  0x1a   :  { %63 = vadd.xlane.f32.xlu0 %v62_v16  ;;  %vm313_vm4 = vcmp.lt.s32.totalorder %v621_v6, %v308_v34  ;;  %v312_v3 = vrot.slane %v304_v2, %v627_v10 }
  0x1b   :  { %v315_v35 = vsel %vm313_vm4, 1, %v560_v8  ;;  %461 = vmatpush3.bf16.xpose.msra.mxu0 %v227_v44  ;;  %p543_p9 = pnand %p542_p8, %p536_p5 }
  0x1c   :  { %480 = vmatprep.subr.msk.bf16.mxu0 %vm61_vm0, %v496_v45  ;;  %vm314_vm5 = vcmp.lt.s32.totalorder %v621_v6, %v312_v3 }
  0x1d   :  { %v316_v4 = vsel %vm314_vm5, 1, %v560_v8 }
  0x1e   :  { %66 = vadd.xlane.f32.xlu0 %v65_v17 }
  0x23   :  { %463 = vmatpush3.bf16.xpose.msra.mxu0 %v224_v46 }
  0x24   :  { %481 = vmatprep.subr.msk.bf16.mxu0 %vm61_vm0, %v497_v47 }
  0x2b   :  { %465 = vmatpush3.bf16.xpose.msra.mxu0 %v221_v48 }
  0x2c   :  { %482 = vmatprep.subr.msk.bf16.mxu0 %vm61_vm0, %v498_v49 }
  0x33   :  { %467 = vmatpush3.bf16.xpose.msra.mxu0 %v218_v50 }
  0x34   :  { %483 = vmatprep.subr.msk.bf16.mxu0 %vm61_vm0, %v499_v52 }
  0x3b   :  { %469 = vmatpush3.bf16.xpose.msra.mxu0 %v215_v53 }
  0x3c   :  { %484 = vmatprep.subr.msk.bf16.mxu0 %vm61_vm0, %v500_v55 }
  0x43   :  { %471 = vmatpush3.bf16.xpose.msra.mxu0 %v212_v57 }
  0x44   :  { %485 = vmatprep.subr.msk.bf16.mxu0 %vm61_vm0, %v501_v61 }
  0x4b   :  { %473 = vmatpush3.bf16.xpose.msra.mxu0 %v209_v62 }
  0x8d   :  { %v73_v23 = vpop.permute.xlu1 %72 }
  0x8e   :  { %vm74_vm2 = vcmp.lt.s32.totalorder %v69_v18, %v73_v23 }
  0xa3   :  { %v64_v19 = vpop.xlane.xlu0 %63 }
  0xa4   :  { %v80_v25 = vrot.slane %v64_v19, %v79_v20 }
  0xa7   :  { %v67_v24 = vpop.xlane.xlu0 %66 }
  0xa8   :  { %v84_v26 = vrot.slane %v67_v24, %v79_v20 }
  0xaa   :  { %v86_v28 = vsel %vm85_vm1, %v84_v26, %v80_v25 }
  0xab   :  { %v88_v29 = vsel %vm74_vm2, %v86_v28, -1e+30  ;;  %v562_v28 = vmov 8  }
  0xac   :  { %v90_v30 = vsel %vm89_vm3, %v88_v29, -inf }
  0xad   :  { %91 = vmax.xlane.f32.xlu1 %v90_v30 }
  0xbe   :  { %318 = vperm.xlu1 %491, %v315_v35  }
 0x136   :  { %v92_v36 = vpop.xlane.xlu1 %91 }
 0x137   :  { %v93_v37 = vsub.f32 %v88_v29, %v92_v36 }
 0x139   :  { %v94_v38 = vmul.f32 1.442695, %v93_v37 }
 0x13a   :  { %v319_v34 = vpop.permute.xlu1 %318 }
 0x13b   :  { %503 = vpow2.f32 %v94_v38  ;;  %vm323_vm7 = vcmp.eq.s32.totalorder %v319_v34, 1 }
 0x148   :  { %v504_v39 = vpop.eup %503 }
 0x149   :  { %v96_v40 = vsel %vm89_vm3, %v504_v39, 0.0 }
 0x14a   :  { %97 = vadd.xlane.f32.xlu0 %v96_v40 }
 0x1d3   :  { %v98_v51 = vpop.xlane.xlu0 %97 }
 0x1d4   :  { %505 = vrcp.f32 %v98_v51 }
 0x1e1   :  { %v506_v54 = vpop.eup %505 }
 0x1e2   :  { %v100_v56 = vmul.f32 %v506_v54, %v504_v39 }
 0x1e4   :  { %v104_v58 = vrot.slane %v100_v56, %v627_v10  ;;  %v111_v60 = vrot.slane %v100_v56, %v110_v59 }
 0x1e6   :  { %106 = vbcast.lane.b32.xlu0 %v104_v58, 256 }
 0x1ea   :  { %113 = vbcast.lane.b32.xlu0 %v111_v60, 256 }
 0x1ee   :  { %321 = vperm.xlu0 %492, %v316_v4  }
 0x1f2   :  { %493 = vset.pattern.permute.xlu0 %v562_v28 }
 0x258   :  { %v107_v5 = vpop.permute.xlu0 %106 }
 0x259   :  { %v115_v7 = vmul.f32 %v446_v9, %v107_v5 }
 0x25b   :  { %v117_v12 = vsel %vm61_vm0, %v115_v7, 0.0 }
 0x25c   :  { %v118_v13 = vrot.slane %v117_v12, 4  ;;  %v114_v14 = vpop.permute.xlu0 %113 }
 0x25d   :  { %v116_v15 = vmul.f32 %v447_v11, %v114_v14 }
 0x25e   :  { %v119_v16 = vadd.f32 %v118_v13, %v117_v12 }
 0x25f   :  { %v124_v17 = vsel %vm61_vm0, %v116_v15, 0.0 }
 0x260   :  { %v120_v10 = vrot.slane %v119_v16, 2  ;;  %v125_v18 = vrot.slane %v124_v17, 4 }
 0x262   :  { %v121_v6 = vadd.f32 %v120_v10, %v119_v16  ;;  %v126_v19 = vadd.f32 %v125_v18, %v124_v17 }
 0x264   :  { %v122_v8 = vrot.slane %v121_v6, 1  ;;  %v127_v20 = vrot.slane %v126_v19, 2 }
 0x266   :  { %v123_v21 = vadd.f32 %v122_v8, %v121_v6  ;;  %v128_v22 = vadd.f32 %v127_v20, %v126_v19  ;;  %v388_v19 = vstv %s429_s3 }
 0x268   :  { %v129_v23 = vrot.slane %v128_v22, 1  ;;  %v133_v9 = vpack.c.bf16 %v123_v21, %v123_v21 }
 0x269   :  { %v322_v33 = vpop.permute.xlu0 %321 }
 0x26a   :  { %v130_v24 = vadd.f32 %v129_v23, %v128_v22  ;;  %v142_v26 = vunpack.c.l.b16 %v133_v9  ;;  %vm324_vm6 = vcmp.eq.s32.totalorder %v322_v33, 1  ;;  %v385_v9 = vstv %s41_s6 }
 0x26c   :  { %v134_v25 = vpack.c.bf16 %v130_v24, %v130_v24 }
 0x26e   :  { %v143_v27 = vunpack.c.l.b16 %v134_v25 }
 0x270   :  { %v144_v0 = vsel %vm85_vm1, %v143_v27, %v142_v26 }
 0x271   :  { %v145_v11 = vpack.c.b16 %v144_v0, %v144_v0 }
 0x273   :  { %475 = vmatmul.mubr.msk.bf16.vlgmr.msra.gmra.mxu0 %vm61_vm0, %v145_v11 }
 0x333   :  { %v706_v29 = vpop.f32.mrf.mxu0 }
 0x334   :  { %v389_v21 = vmul.f32 %v706_v29, %v388_v19 }
 0x335   :  { %v266_v30 = vpop.f32.mrf.mxu0 }
 0x336   :  { %v325_v37 = vsel %vm323_vm7, %v266_v30, -1e+30  ;;  %v391_v26 = vrot.slane %v389_v21, 1 }
 0x337   :  { %v477_v31 = vpop.f32.mrf.mxu0  ;;  %v327_v38 = vrot.slane %v325_v37, 4 }
 0x339   :  { %v269_v32 = vpop.f32.mrf.mxu0  ;;  %v328_v40 = vmax.f32 %v325_v37, %v327_v38 }
 0x33a   :  { %368 = vperm.xlu0 %493, %v269_v32   ;;  %v326_v35 = vsel %vm324_vm6, %v269_v32, -1e+30 }
 0x33b   :  { %v333_v36 = vrot.slane %v326_v35, 4  ;;  %v329_v42 = vrot.slane %v328_v40, 2 }
 0x33d   :  { %v334_v39 = vmax.f32 %v326_v35, %v333_v36  ;;  %v330_v44 = vmax.f32 %v328_v40, %v329_v42 }
 0x33e   :  { %363 = vperm.xlu0 %493, %v266_v30  }
 0x33f   :  { %v335_v41 = vrot.slane %v334_v39, 2  ;;  %v331_v46 = vrot.slane %v330_v44, 1 }
 0x341   :  { %v336_v43 = vmax.f32 %v334_v39, %v335_v41  ;;  %v332_v48 = vmax.f32 %v330_v44, %v331_v46 }
 0x343   :  { %v337_v45 = vrot.slane %v336_v43, 1  ;;  %v339_v50 = vsub.f32 %v325_v37, %v332_v48 }
 0x345   :  { %v338_v47 = vmax.f32 %v336_v43, %v337_v45  ;;  %v341_v52 = vmul.f32 1.442695, %v339_v50 }
 0x347   :  { %v340_v49 = vsub.f32 %v326_v35, %v338_v47 }
 0x349   :  { %v343_v51 = vmul.f32 1.442695, %v340_v49 }
 0x34b   :  { %507 = vpow2.f32 %v343_v51 }
 0x34c   :  { %509 = vpow2.f32 %v341_v52 }
 0x358   :  { %v508_v53 = vpop.eup %507 }
 0x359   :  { %v351_v54 = vrot.slane %v508_v53, 4  ;;  %v510_v55 = vpop.eup %509 }
 0x35a   :  { %v345_v57 = vrot.slane %v510_v55, 4 }
 0x35b   :  { %v352_v56 = vadd.f32 %v508_v53, %v351_v54 }
 0x35c   :  { %v346_v59 = vadd.f32 %v510_v55, %v345_v57 }
 0x35d   :  { %v353_v58 = vrot.slane %v352_v56, 2 }
 0x35e   :  { %v347_v61 = vrot.slane %v346_v59, 2 }
 0x35f   :  { %v354_v60 = vadd.f32 %v353_v58, %v352_v56 }
 0x360   :  { %v348_v63 = vadd.f32 %v347_v61, %v346_v59 }
 0x361   :  { %v355_v62 = vrot.slane %v354_v60, 1 }
 0x362   :  { %v349_v2 = vrot.slane %v348_v63, 1 }
 0x363   :  { %v356_v1 = vadd.f32 %v355_v62, %v354_v60 }
 0x364   :  { %v350_v3 = vadd.f32 %v349_v2, %v348_v63 }
 0x365   :  { %511 = vrcp.f32 %v356_v1 }
 0x366   :  { %513 = vrcp.f32 %v350_v3 }
 0x372   :  { %v512_v4 = vpop.eup %511 }
 0x373   :  { %v360_v5 = vmul.f32 %v512_v4, %v508_v53  ;;  %v514_v7 = vpop.eup %513 }
 0x374   :  { %v359_v15 = vmul.f32 %v514_v7, %v510_v55 }
 0x3b5   :  { %v369_v12 = vpop.permute.xlu0 %368 }
 0x3b6   :  { %v372_v13 = vmul.f32 %v369_v12, %v360_v5 }
 0x3b8   :  { %v379_v14 = vrot.slane %v372_v13, 4 }
 0x3b9   :  { %v364_v16 = vpop.permute.xlu0 %363 }
 0x3ba   :  { %v380_v17 = vadd.f32 %v379_v14, %v372_v13  ;;  %v371_v10 = vmul.f32 %v364_v16, %v359_v15 }
 0x3bc   :  { %v381_v18 = vrot.slane %v380_v17, 2  ;;  %v373_v6 = vrot.slane %v371_v10, 4 }
 0x3be   :  { %v382_v8 = vadd.f32 %v381_v18, %v380_v17  ;;  %v374_v20 = vadd.f32 %v373_v6, %v371_v10 }
 0x3c0   :  { %v383_v22 = vrot.slane %v382_v8, 1  ;;  %v375_v23 = vrot.slane %v374_v20, 2 }
 0x3c2   :  { %v384_v24 = vadd.f32 %v383_v22, %v382_v8  ;;  %v376_v25 = vadd.f32 %v375_v23, %v374_v20 }
 0x3c4   :  { %v387_v27 = vadd.f32 %v385_v9, %v384_v24  ;;  %v377_v0 = vrot.slane %v376_v25, 1 }
 0x3c6   :  { %v395_v11 = vadd.f32 %v391_v26, %v387_v27  ;;  %v378_v28 = vadd.f32 %v377_v0, %v376_v25 }
 0x3c8   :  { %v443_v30 = vmul.f32 -1.442695, %v395_v11  ;;  %v386_v31 = vadd.f32 %v385_v9, %v378_v28 }
 0x3ca   :  { %515 = vpow2.f32 %v443_v30  ;;  %v394_v32 = vadd.f32 %v389_v21, %v386_v31 }
 0x3cc   :  { %v442_v33 = vmul.f32 -1.442695, %v394_v32 }
 0x3ce   :  { %517 = vpow2.f32 %v442_v33 }
 0x3d7   :  { %v516_v34 = vpop.eup %515 }
 0x3d8   :  { %v403_v35 = vadd.f32 1.0, %v516_v34 }
 0x3da   :  { %519 = vrcp.f32 %v403_v35 }
 0x3db   :  { %v518_v29 = vpop.eup %517 }
 0x3dc   :  { %v402_v36 = vadd.f32 1.0, %v518_v29 }
 0x3de   :  { %521 = vrcp.f32 %v402_v36 }
 0x3e7   :  { %v520_v37 = vpop.eup %519 }
 0x3e8   :  { %v410_v38 = vrot.slane %v520_v37, 7 }
 0x3eb   :  { %v522_v39 = vpop.eup %521 }
 0x3ec   :  { %v411_v40 = vsel %vm85_vm1, %v410_v38, %v522_v39 }
 0x3ed   :  { %413 = vst [vmem:[#allocation5] sm:$0x3] %v411_v40 }
 0x3ee   :  { %546 = shalt.err (!%p543_p9)
}
 0x3ef   :  { %423 = dma.vmem_to_hbm [thread:$0]  %s421_s30, 32, %s720_s7, [#allocation3]  }
 0x3f0   :  { %557 = dma.done.wait [#allocation3], 32  }
 0x3f1   :  { %558 = vsyncadd [#allocation3], 4294967264 }
 0x3f2   :  { %427 = vsyncpa [#allocation3], 1 }
 0x3f3   :  { %428 = vsyncpa [#allocation4], 1 }

</bundles_post_ra>
